<compile_context>
chip_gen: v5e
topology: v5e:2x2
jax: 0.10.0
libtpu: 0.0.40
codegen_flags: <defaults>
</compile_context>

<pallas_src>
import jax
import jax.numpy as jnp
from jax import lax
from jax.experimental import pallas as pl
from jax.experimental.pallas import tpu as pltpu


def _pair(v):
    return (v, v) if isinstance(v, int) else tuple(v)


def _min_value(dtype):
    if jnp.issubdtype(dtype, jnp.floating):
        return -jnp.inf
    if jnp.issubdtype(dtype, jnp.integer):
        return jnp.iinfo(dtype).min
    return False  # bool


def _vmem_capacity_bytes():
    try:
        return int(pltpu.get_tpu_info().vmem_capacity_bytes)
    except Exception:
        return 64 * 1024 * 1024  # conservative default (v7x per-core VMEM)


def _make_kernel(kh, kw, sh, sw, Ho, Wo, HP):
    """Pooling kernel over one channel tile.

    x_ref: (sw, HP, WQ, TL) with x_ref[r, h, q, c] = x_padded[c, h, q*sw + r]
    o_ref: (Ho, Wo, TL)
    """

    def kernel(x_ref, o_ref):
        tl = x_ref.shape[-1]
        acc = None
        for i in range(kh):                       # window row offset
            # Pick rows i + oh*sh (oh in [0, Ho)) using only a unit-stride
            # slice + leading-dim reshape + static index (no strided ops):
            # rows [e, e + Ho*sh) reshaped to (Ho, sh, ...) and column `sel`.
            e = min(i, HP - Ho * sh)              # static; HP >= Ho*sh
            sel = i - e                           # 0 <= sel < sh
            for j in range(kw):                   # window col offset
                q, r = divmod(j, sw)              # col = (q + ow)*sw + r
                v = x_ref[r, e:e + Ho * sh, q:q + Wo, :]   # (Ho*sh, Wo, TL)
                if sh > 1:
                    v = v.reshape(Ho, sh, Wo, tl)[:, sel]  # (Ho, Wo, TL)
                acc = v if acc is None else jnp.maximum(acc, v)
        o_ref[...] = acc

    return kernel


def max_pool2d_pallas(x, kernel_size, stride=None, padding=0):
    """Matches torch.nn.functional.max_pool2d (dilation=1, ceil_mode=False,
    NCHW input, floor output size)."""
    kh, kw = _pair(kernel_size)
    sh, sw = _pair(kernel_size if stride is None else stride)
    ph, pw = _pair(padding)
    # TODO(synk): ceil_mode / dilation / return_indices are not supported.

    N, C, H, W = x.shape
    NC = N * C
    Ho = (H + 2 * ph - kh) // sh + 1
    Wo = (W + 2 * pw - kw) // sw + 1
    assert Ho > 0 and Wo > 0, "pooling window larger than padded input"

    qmax = (kw - 1) // sw
    HP = max(H + 2 * ph, Ho * sh)                       # rows seen by kernel
    WQ = max(-(-(W + 2 * pw) // sw), Wo + qmax)         # W groups of width sw
    pad_val = _min_value(x.dtype)

    # Single layout pass: max-identity padding + split W into (group, phase)
    # + move channels to the lane dimension.  Padding==0 with aligned W makes
    # the jnp.pad a zero-width no-op; everything fuses into one XLA copy.
    xp = jnp.pad(
        x,
        ((0, 0), (0, 0), (ph, HP - H - ph), (pw, WQ * sw - W - pw)),
        constant_values=pad_val,
    )
    P = (
        xp.reshape(N, C, HP, WQ, sw)
        .transpose(4, 2, 3, 0, 1)                       # (sw, HP, WQ, N, C)
        .reshape(sw, HP, WQ, NC)
    )

    # Channel (lane) tile: generation-aware VMEM budget, and keep >= 2 grid
    # steps when possible so v7x's two TensorCores both get work.
    itemsize = jnp.dtype(x.dtype).itemsize
    per_lane_bytes = (sw * HP * WQ + Ho * Wo) * itemsize
    if NC <= 128:
        tl = NC                                         # full (small) lane dim
    else:
        budget = _vmem_capacity_bytes() // 4            # leave room for dbl-buf
        tl_budget = max(128, (budget // (2 * per_lane_bytes)) // 128 * 128)
        tl_two_steps = max(128, pl.cdiv(pl.cdiv(NC, 2), 128) * 128)
        tl = int(min(tl_budget, tl_two_steps))
    # TODO(synk): huge H*W with tl=128 can still exceed VMEM; that regime would
    # need an extra (halo-aware) spatial grid axis.

    grid = (pl.cdiv(NC, tl),)
    kernel = _make_kernel(kh, kw, sh, sw, Ho, Wo, HP)

    vmem_limit = min(_vmem_capacity_bytes() * 3 // 4, 96 * 1024 * 1024)

    out = pl.pallas_call(
        kernel,
        out_shape=jax.ShapeDtypeStruct((Ho, Wo, NC), x.dtype),
        grid_spec=pltpu.PrefetchScalarGridSpec(
            num_scalar_prefetch=0,
            grid=grid,
            in_specs=[pl.BlockSpec((sw, HP, WQ, tl), lambda c: (0, 0, 0, c))],
            out_specs=pl.BlockSpec((Ho, Wo, tl), lambda c: (0, 0, c)),
        ),
        compiler_params=pltpu.CompilerParams(
            dimension_semantics=("parallel",),
            vmem_limit_bytes=int(vmem_limit),
        ),
        cost_estimate=pl.CostEstimate(
            flops=NC * Ho * Wo * max(kh * kw - 1, 1),
            transcendentals=0,
            bytes_accessed=(P.size + Ho * Wo * NC) * itemsize,
        ),
    )(P)

    # (Ho, Wo, NC) -> (N, C, Ho, Wo)
    return out.transpose(2, 0, 1).reshape(N, C, Ho, Wo)


class MaxPoolingPallas:
    """Mirrors the PyTorch MaxPooling module's constructor contract."""

    def __init__(self, in_channels, out_channels, device=None, **kwargs):
        if in_channels != out_channels:
            raise Exception(
                "Pooling layers can only have output multiplier of 1."
            )
        kwargs.pop("dilation", None)
        kwargs.pop("groups", None)
        self.kwargs = kwargs

    def __call__(self, x):
        return max_pool2d_pallas(x, **self.kwargs)


if __name__ == "__main__":
    key = jax.random.PRNGKey(0)
    N, C, H, W = 2, 4, 16, 16
    x = jax.random.normal(key, (N, C, H, W), dtype=jnp.float32)

    # Case 1: 2x2, stride 2, no padding (stride == kernel).
    mod1 = MaxPoolingPallas(C, C, kernel_size=2, stride=2, padding=0,
                            dilation=1, groups=1)
    y1 = jax.block_until_ready(mod1(x))
    ref1 = lax.reduce_window(
        x, -jnp.inf, lax.max,
        window_dimensions=(1, 1, 2, 2),
        window_strides=(1, 1, 2, 2),
        padding=((0, 0), (0, 0), (0, 0), (0, 0)),
    )
    assert y1.shape == (N, C, 8, 8), y1.shape
    assert y1.dtype == x.dtype
    assert jnp.allclose(y1, ref1), "mismatch vs reference max_pool2d (2x2 s2)"

    # Case 2: overlapping 3x3, stride 2, padding 1.
    mod2 = MaxPoolingPallas(C, C, kernel_size=3, stride=2, padding=1,
                            dilation=1, groups=1)
    y2 = jax.block_until_ready(mod2(x))
    ref2 = lax.reduce_window(
        x, -jnp.inf, lax.max,
        window_dimensions=(1, 1, 3, 3),
        window_strides=(1, 1, 2, 2),
        padding=((0, 0), (0, 0), (1, 1), (1, 1)),
    )
    assert y2.shape == (N, C, 8, 8), y2.shape
    assert y2.dtype == x.dtype
    assert jnp.allclose(y2, ref2), "mismatch vs reference max_pool2d (3x3 s2 p1)"

    print("KERNEL_OK")
</pallas_src>

<mosaic_0001>
module attributes {stable_mosaic.version = 11 : i64} {
  func.func @kernel(%arg0: i32, %arg1: memref<2x16x8x8xf32, #tpu.memory_space<vmem>>, %arg2: memref<8x8x8xf32, #tpu.memory_space<vmem>>) attributes {dimension_semantics = [#tpu.dimension_semantics<parallel>], iteration_bounds = array<i64: 1>, scalar_prefetch = 0 : i64, scratch_operands = 0 : i64, tpu.core_type = #tpu.core_type<tc>, window_params = [{transform_indices = @transform_0, window_bounds = array<i64: 2, 16, 8, 8>}, {transform_indices = @transform_1, window_bounds = array<i64: 8, 8, 8>}]} {
    %c0 = arith.constant 0 : index
    %c0_0 = arith.constant 0 : index
    %c0_1 = arith.constant 0 : index
    %c0_2 = arith.constant 0 : index
    %0 = vector.load %arg1[%c0, %c0_0, %c0_1, %c0_2] : memref<2x16x8x8xf32, #tpu.memory_space<vmem>>, vector<1x16x8x8xf32>
    %1 = vector.shape_cast %0 : vector<1x16x8x8xf32> to vector<16x8x8xf32>
    %2 = vector.shape_cast %1 : vector<16x8x8xf32> to vector<8x2x8x8xf32>
    %3 = vector.extract_strided_slice %2 {offsets = [0, 0, 0, 0], sizes = [8, 1, 8, 8], strides = [1, 1, 1, 1]} : vector<8x2x8x8xf32> to vector<8x1x8x8xf32>
    %4 = vector.shape_cast %3 : vector<8x1x8x8xf32> to vector<8x8x8xf32>
    %c1 = arith.constant 1 : index
    %c0_3 = arith.constant 0 : index
    %c0_4 = arith.constant 0 : index
    %c0_5 = arith.constant 0 : index
    %5 = vector.load %arg1[%c1, %c0_3, %c0_4, %c0_5] : memref<2x16x8x8xf32, #tpu.memory_space<vmem>>, vector<1x16x8x8xf32>
    %6 = vector.shape_cast %5 : vector<1x16x8x8xf32> to vector<16x8x8xf32>
    %7 = vector.shape_cast %6 : vector<16x8x8xf32> to vector<8x2x8x8xf32>
    %8 = vector.extract_strided_slice %7 {offsets = [0, 0, 0, 0], sizes = [8, 1, 8, 8], strides = [1, 1, 1, 1]} : vector<8x2x8x8xf32> to vector<8x1x8x8xf32>
    %9 = vector.shape_cast %8 : vector<8x1x8x8xf32> to vector<8x8x8xf32>
    %10 = arith.maximumf %4, %9 : vector<8x8x8xf32>
    %c0_6 = arith.constant 0 : index
    %c0_7 = arith.constant 0 : index
    %c0_8 = arith.constant 0 : index
    %c0_9 = arith.constant 0 : index
    %11 = vector.load %arg1[%c0_6, %c0_7, %c0_8, %c0_9] : memref<2x16x8x8xf32, #tpu.memory_space<vmem>>, vector<1x16x8x8xf32>
    %12 = vector.shape_cast %11 : vector<1x16x8x8xf32> to vector<16x8x8xf32>
    %13 = vector.shape_cast %12 : vector<16x8x8xf32> to vector<8x2x8x8xf32>
    %14 = vector.extract_strided_slice %13 {offsets = [0, 1, 0, 0], sizes = [8, 1, 8, 8], strides = [1, 1, 1, 1]} : vector<8x2x8x8xf32> to vector<8x1x8x8xf32>
    %15 = vector.shape_cast %14 : vector<8x1x8x8xf32> to vector<8x8x8xf32>
    %16 = arith.maximumf %10, %15 : vector<8x8x8xf32>
    %c1_10 = arith.constant 1 : index
    %c0_11 = arith.constant 0 : index
    %c0_12 = arith.constant 0 : index
    %c0_13 = arith.constant 0 : index
    %17 = vector.load %arg1[%c1_10, %c0_11, %c0_12, %c0_13] : memref<2x16x8x8xf32, #tpu.memory_space<vmem>>, vector<1x16x8x8xf32>
    %18 = vector.shape_cast %17 : vector<1x16x8x8xf32> to vector<16x8x8xf32>
    %19 = vector.shape_cast %18 : vector<16x8x8xf32> to vector<8x2x8x8xf32>
    %20 = vector.extract_strided_slice %19 {offsets = [0, 1, 0, 0], sizes = [8, 1, 8, 8], strides = [1, 1, 1, 1]} : vector<8x2x8x8xf32> to vector<8x1x8x8xf32>
    %21 = vector.shape_cast %20 : vector<8x1x8x8xf32> to vector<8x8x8xf32>
    %22 = arith.maximumf %16, %21 : vector<8x8x8xf32>
    %c0_14 = arith.constant 0 : index
    %c0_15 = arith.constant 0 : index
    %c0_16 = arith.constant 0 : index
    %23 = vector.load %arg2[%c0_14, %c0_15, %c0_16] : memref<8x8x8xf32, #tpu.memory_space<vmem>>, vector<8x8x8xf32>
    tpu.vector_store %arg2[%c0_14, %c0_15, %c0_16], %22 {strides = array<i32>} : memref<8x8x8xf32, #tpu.memory_space<vmem>>, vector<8x8x8xf32>,
    return
  }
  func.func @transform_0(%arg0: i32) -> (i32, i32, i32, i32) {
    %c0_i32 = arith.constant 0 : i32
    %c0_i32_0 = arith.constant 0 : i32
    %c0_i32_1 = arith.constant 0 : i32
    %c0_i32_2 = arith.constant 0 : i32
    return %c0_i32, %c0_i32_0, %c0_i32_1, %arg0 : i32, i32, i32, i32
  }
  func.func @transform_1(%arg0: i32) -> (i32, i32, i32) {
    %c0_i32 = arith.constant 0 : i32
    %c0_i32_0 = arith.constant 0 : i32
    %c0_i32_1 = arith.constant 0 : i32
    return %c0_i32, %c0_i32_0, %arg0 : i32, i32, i32
  }
}

</mosaic_0001>

<bundles_post_ra>
// kernel: tpu_custom_call.1
= control target key start
LH: loop header
LB: loop body
LE: loop exit
PB: predicated region body
PF: predicated region fallthrough
CT: control target
= control target key end

     0   :  { %vm66_vm0 = vcmask 64512   ;;  %s258_s0 = inlined_call_operand.vmem [shape: f32[2,16,8,8], index: 0, kind: input, shape index: {}]   ;;  %s259_s1 = inlined_call_operand.hbm [shape: f32[8,8,8], index: 1, kind: output, shape index: {}]  }
   0x1   :  { %v9_v0 = vld [vmem:[%s258_s0] sm:$0xff]  ;;  %v10_v1 = vld [vmem:[%s258_s0 + $0x8] sm:$0xff]  ;;  %v11_v5 = vld [vmem:[%s258_s0 + $0x10] sm:$0xff] }
   0x2   :  { %v93_v2 = vld [vmem:[%s258_s0 + $0x80] sm:$0xff]  ;;  %v94_v3 = vld [vmem:[%s258_s0 + $0x88] sm:$0xff]  ;;  %v12_v6 = vld [vmem:[%s258_s0 + $0x18] sm:$0xff] }
   0x3   :  { %v42_v4 = vmax.f32 %v9_v0, %v93_v2  ;;  %v95_v7 = vld [vmem:[%s258_s0 + $0x90] sm:$0xff]  ;;  %v13_v8 = vld [vmem:[%s258_s0 + $0x20] sm:$0xff]  ;;  %v96_v10 = vld [vmem:[%s258_s0 + $0x98] sm:$0xff] }
   0x4   :  { %v43_v11 = vmax.f32 %v11_v5, %v95_v7  ;;  %v14_v12 = vld [vmem:[%s258_s0 + $0x28] sm:$0xff]  ;;  %v97_v13 = vld [vmem:[%s258_s0 + $0xa0] sm:$0xff]  ;;  %v15_v15 = vld [vmem:[%s258_s0 + $0x30] sm:$0xff] }
   0x5   :  { %v50_v9 = vmax.f32 %v42_v4, %v10_v1  ;;  %v44_v14 = vmax.f32 %v13_v8, %v97_v13  ;;  %v16_v16 = vld [vmem:[%s258_s0 + $0x38] sm:$0xff]  ;;  %v99_v17 = vld [vmem:[%s258_s0 + $0xb0] sm:$0xff]  ;;  %v98_v20 = vld [vmem:[%s258_s0 + $0xa8] sm:$0xff] }
   0x6   :  { %v51_v19 = vmax.f32 %v43_v11, %v12_v6  ;;  %v100_v21 = vld [vmem:[%s258_s0 + $0xb8] sm:$0xff]  ;;  %v45_v22 = vmax.f32 %v15_v15, %v99_v17  ;;  %v17_v23 = vld [vmem:[%s258_s0 + $0x40] sm:$0xff]  ;;  %v18_v25 = vld [vmem:[%s258_s0 + $0x48] sm:$0xff] }
   0x7   :  { %v58_v18 = vmax.f32 %v50_v9, %v94_v3  ;;  %v52_v24 = vmax.f32 %v44_v14, %v14_v12  ;;  %v101_v26 = vld [vmem:[%s258_s0 + $0xc0] sm:$0xff]  ;;  %v19_v27 = vld [vmem:[%s258_s0 + $0x50] sm:$0xff]  ;;  %v102_v30 = vld [vmem:[%s258_s0 + $0xc8] sm:$0xff] }
   0x8   :  { %v59_v28 = vmax.f32 %v51_v19, %v96_v10  ;;  %v53_v29 = vmax.f32 %v45_v22, %v16_v16  ;;  %v46_v31 = vmax.f32 %v17_v23, %v101_v26  ;;  %v20_v32 = vld [vmem:[%s258_s0 + $0x58] sm:$0xff]  ;;  %v103_v33 = vld [vmem:[%s258_s0 + $0xd0] sm:$0xff]  ;;  %v21_v36 = vld [vmem:[%s258_s0 + $0x60] sm:$0xff] }
   0x9   :  { %67 = vst.msk [vmem:[#allocation2] sm:$0xff] %vm66_vm0, %v58_v18  ;;  %v60_v34 = vmax.f32 %v52_v24, %v98_v20  ;;  %v47_v35 = vmax.f32 %v19_v27, %v103_v33  ;;  %v22_v37 = vld [vmem:[%s258_s0 + $0x68] sm:$0xff]  ;;  %v105_v38 = vld [vmem:[%s258_s0 + $0xe0] sm:$0xff]  ;;  %v104_v41 = vld [vmem:[%s258_s0 + $0xd8] sm:$0xff] }
   0xa   :  { %68 = vst.msk [vmem:[#allocation2 + $0x8] sm:$0xff] %vm66_vm0, %v59_v28  ;;  %v61_v39 = vmax.f32 %v53_v29, %v100_v21  ;;  %v54_v40 = vmax.f32 %v46_v31, %v18_v25  ;;  %v106_v42 = vld [vmem:[%s258_s0 + $0xe8] sm:$0xff]  ;;  %v48_v43 = vmax.f32 %v21_v36, %v105_v38  ;;  %v23_v44 = vld [vmem:[%s258_s0 + $0x70] sm:$0xff]  ;;  %v24_v46 = vld [vmem:[%s258_s0 + $0x78] sm:$0xff] }
   0xb   :  { %69 = vst.msk [vmem:[#allocation2 + $0x10] sm:$0xff] %vm66_vm0, %v60_v34  ;;  %v55_v45 = vmax.f32 %v47_v35, %v20_v32  ;;  %v107_v47 = vld [vmem:[%s258_s0 + $0xf0] sm:$0xff] }
   0xc   :  { %6 = vsyncpa [#allocation3], 0  ;;  %70 = vst.msk [vmem:[#allocation2 + $0x18] sm:$0xff] %vm66_vm0, %v61_v39  ;;  %v62_v48 = vmax.f32 %v54_v40, %v102_v30  ;;  %v56_v49 = vmax.f32 %v48_v43, %v22_v37  ;;  %v49_v50 = vmax.f32 %v23_v44, %v107_v47  ;;  %s138_s10 = smov [#allocation2]   ;;  %s81_s14 = sshll.u32 %s259_s1, 4  ;;  %v108_v52 = vld [vmem:[%s258_s0 + $0xf8] sm:$0xff]  ;;  %s82_s14 = int_to_ptr.hbm [resolvable:$true] %s81_s14 }
   0xd   :  { %s79_s11 = sshll.u32 %s138_s10, 4  ;;  %v63_v51 = vmax.f32 %v55_v45, %v104_v41  ;;  %s139_s17 = smov 128   ;;  %s80_s11 = int_to_ptr.vmem [resolvable:$true] %s79_s11 }
   0xe   :  { %71 = vst.msk [vmem:[#allocation2 + $0x20] sm:$0xff] %vm66_vm0, %v62_v48  ;;  %v64_v53 = vmax.f32 %v56_v49, %v106_v42  ;;  %v57_v54 = vmax.f32 %v49_v50, %v24_v46  ;;  %s140_s1 = smov 8  }
   0xf   :  { %72 = vst.msk [vmem:[#allocation2 + $0x28] sm:$0xff] %vm66_vm0, %v63_v51 }
  0x10   :  { %73 = vst.msk [vmem:[#allocation2 + $0x30] sm:$0xff] %vm66_vm0, %v64_v53  ;;  %v65_v55 = vmax.f32 %v57_v54, %v108_v52 }
  0x12   :  { %74 = vst.msk [vmem:[#allocation2 + $0x38] sm:$0xff] %vm66_vm0, %v65_v55 }
  0x13   :  { %87 = dma.vmem_to_hbm [thread:$0]  %s80_s11, 1024, %s82_s14, [#allocation3], %s139_s17, %s139_s17, %s140_s1  }
  0x14   :  { %136 = dma.done.wait [#allocation3], 1024  }
  0x15   :  { %137 = vsyncadd [#allocation3], 4294966272 }
  0x16   :  { %92 = vsyncpa [#allocation3], 1 }

</bundles_post_ra>
